<compile_context>
chip_gen: v6e
topology: v6e:2x2x1
jax: 0.10.0
libtpu: 0.0.40
codegen_flags: <defaults>
</compile_context>

<pallas_src>
import functools

import jax
import jax.numpy as jnp
from jax.experimental import pallas as pl
from jax.experimental.pallas import tpu as pltpu


_MIN_GRID_STEPS = 8          # even (v7x 2-TC split) and >= 4 for pipelining
_MIB = 1024 * 1024

# Conservative (v7x-safe) defaults; bumped for v5e/v6e by _vmem_budget().
_V7X_WORKING_SET_BYTES = 24 * _MIB
_V7X_VMEM_LIMIT_BYTES = 32 * _MIB
_BIG_VMEM_WORKING_SET_BYTES = 56 * _MIB
_BIG_VMEM_LIMIT_BYTES = 64 * _MIB


def _cdiv(a, b):
    return -(-a // b)


def _round_up(v, m):
    return ((v + m - 1) // m) * m


def _vmem_budget():
    """(working_set_bytes, vmem_limit_bytes), generation-aware."""
    cap = None
    try:
        info = pltpu.get_tpu_info()
        cap = getattr(info, "vmem_capacity_bytes", None)
        if cap is None:
            cap = getattr(info, "vmem_size_bytes", None)
    except Exception:
        cap = None
    if cap is not None and cap >= 100 * _MIB:
        # v5e / v6e: 128 MiB physical VMEM -> bigger tiles amortize the
        # ~0.35 us per-grid-step overhead.
        return _BIG_VMEM_WORKING_SET_BYTES, _BIG_VMEM_LIMIT_BYTES
    # v7x (64 MiB per TC) or unknown: stay conservative, leave headroom for
    # compiler temporaries.
    return _V7X_WORKING_SET_BYTES, _V7X_VMEM_LIMIT_BYTES


def _layernorm_kernel(alpha_ref, bias_ref, x_ref, o_ref, *, eps):
    # alpha_ref / bias_ref: shape-(1,) scalars in SMEM.
    # x_ref / o_ref: (tile_rows, d_model) VMEM tiles.
    d = x_ref.shape[-1]

    # Pass 1: per-row mean (one streaming read of the tile).
    mean = jnp.sum(x_ref[...].astype(jnp.float32), axis=-1, keepdims=True) * (
        jnp.float32(1.0 / d))

    # Pass 2: unbiased (n-1) variance via the numerically-stable centered
    # form; reads the tile again instead of holding a full-tile diff temp.
    centered = x_ref[...].astype(jnp.float32) - mean
    var = jnp.sum(centered * centered, axis=-1, keepdims=True) / jnp.float32(d - 1)
    std = jnp.sqrt(var)

    # Fused per-row scale: (alpha * bias) / (std + eps).
    scale = (alpha_ref[0] * bias_ref[0]) * pl.reciprocal(
        std + jnp.float32(eps), approx=False)

    # Pass 3: write, recomputing (x - mean) rather than keeping it live.
    o_ref[...] = ((x_ref[...].astype(jnp.float32) - mean) * scale).astype(
        o_ref.dtype)


def _choose_tile_rows(rows, d_model, itemsize, working_set_bytes):
    """Row tile: largest that fits the budget, but >= an even >=8-step grid."""
    row_align = max(8, 32 // max(1, itemsize))   # f32: 8, bf16: 16, int8: 32
    if rows <= row_align:
        # Tiny input: one full block (block == full dims is layout-legal).
        return rows

    bytes_per_row = d_model * itemsize
    # in + out tiles, double-buffered => 4 live tiles.
    max_tile = working_set_bytes // (4 * bytes_per_row)
    max_tile = max(row_align, (max_tile // row_align) * row_align)

    # Never emit a 1-step grid; keep the step count even (v7x 2-TC split) and
    # balance the tail so the last block is not mostly padding.
    n_steps = max(_MIN_GRID_STEPS, _cdiv(rows, max_tile))
    n_steps = _round_up(n_steps, 2)
    tile = _round_up(_cdiv(rows, n_steps), row_align)
    tile = max(row_align, min(tile, max_tile, _round_up(rows, row_align)))
    return tile


def layer_normalization(x, alpha, bias, *, eps=1e-5, tile_rows=None,
                        working_set_bytes=None, vmem_limit_bytes=None):
    """Pallas TPU implementation of the reference LayerNormalization.forward."""
    orig_shape = x.shape
    d_model = orig_shape[-1]
    rows = 1
    for s in orig_shape[:-1]:
        rows *= s
    x2 = x.reshape(rows, d_model)

    if working_set_bytes is None or vmem_limit_bytes is None:
        ws, lim = _vmem_budget()
        working_set_bytes = working_set_bytes or ws
        vmem_limit_bytes = vmem_limit_bytes or lim

    if tile_rows is None:
        tile_rows = _choose_tile_rows(rows, d_model, x2.dtype.itemsize,
                                      working_set_bytes)

    # Guard (review): if even the chosen (possibly minimum) tile exceeds the
    # base scoped-VMEM limit at huge d_model, raise the limit to fit it.
    required = 4 * tile_rows * d_model * x2.dtype.itemsize + 2 * _MIB
    vmem_limit_bytes = max(vmem_limit_bytes, required)

    # No host-side padding: the tail block (if any) is handled by Pallas'
    # masked out-of-bounds writeback; garbage tail rows never reach HBM.
    # LayerNorm is strictly per-row, so they cannot contaminate valid rows.
    grid = (_cdiv(rows, tile_rows),)
    kernel = functools.partial(_layernorm_kernel, eps=eps)

    # NOTE: for real transformer d_model (multiple of 128) the last dim is
    # lane-dense; the tiny demo d_model is legal (block == full dim) but the
    # store path uses masked vst for it.
    out = pl.pallas_call(
        kernel,
        out_shape=jax.ShapeDtypeStruct((rows, d_model), x.dtype),
        grid=grid,
        in_specs=[
            pl.BlockSpec(memory_space=pltpu.SMEM),  # alpha (1,)
            pl.BlockSpec(memory_space=pltpu.SMEM),  # bias  (1,)
            pl.BlockSpec((tile_rows, d_model), lambda i: (i, 0)),
        ],
        out_specs=pl.BlockSpec((tile_rows, d_model), lambda i: (i, 0)),
        compiler_params=pltpu.CompilerParams(
            dimension_semantics=("parallel",),   # shards the row loop on v7x
            vmem_limit_bytes=int(vmem_limit_bytes),
        ),
    )(alpha, bias, x2)

    return out.reshape(orig_shape)


def encoder_forward(x, mask, layers, alpha, bias, *, eps=1e-5):
    """Encoder.forward: apply layers sequentially, then LayerNormalization."""
    for layer in layers:
        x = layer(x, mask)
    return layer_normalization(x, alpha, bias, eps=eps)


def _layernorm_ref(x, alpha, bias, eps=1e-5):
    mean = jnp.mean(x, axis=-1, keepdims=True)
    std = jnp.std(x, axis=-1, keepdims=True, ddof=1)  # torch.std: unbiased
    return alpha[0] * (x - mean) / (std + eps) * bias[0]


if __name__ == "__main__":
    key = jax.random.PRNGKey(0)

    batch, seq, d_model = 2, 8, 32
    x = jax.random.normal(key, (batch, seq, d_model), dtype=jnp.float32)
    mask = jnp.ones((batch, 1, seq, seq), dtype=jnp.float32)  # unused by norm

    # Exact module init: alpha = ones(1), bias = zeros(1) -> output is zero.
    alpha0 = jnp.ones((1,), dtype=jnp.float32)
    bias0 = jnp.zeros((1,), dtype=jnp.float32)
    layers = []  # TODO(synk): encoder layers are unspecified in the reference.

    out = encoder_forward(x, mask, layers, alpha0, bias0)
    out = jax.block_until_ready(out)
    ref = _layernorm_ref(x, alpha0, bias0)
    assert out.shape == x.shape
    assert jnp.allclose(out, ref, atol=1e-5, rtol=1e-5), "mismatch (init params)"

    # Non-trivial parameters: the init case is identically zero and proves
    # nothing about the normalization math, so verify with alpha=1.5, bias=0.75.
    alpha1 = jnp.full((1,), 1.5, dtype=jnp.float32)
    bias1 = jnp.full((1,), 0.75, dtype=jnp.float32)
    out1 = jax.block_until_ready(layer_normalization(x, alpha1, bias1))
    ref1 = _layernorm_ref(x, alpha1, bias1)
    assert jnp.allclose(out1, ref1, atol=1e-5, rtol=1e-5), "mismatch (nontrivial)"

    # Tail-masking path: rows = 2*9 = 18 not divisible by tile_rows = 8.
    x_tail = jax.random.normal(jax.random.PRNGKey(1), (2, 9, d_model),
                               dtype=jnp.float32)
    out2 = jax.block_until_ready(
        layer_normalization(x_tail, alpha1, bias1, tile_rows=8))
    ref2 = _layernorm_ref(x_tail, alpha1, bias1)
    assert out2.shape == x_tail.shape
    assert jnp.allclose(out2, ref2, atol=1e-5, rtol=1e-5), "mismatch (tail block)"

    # Auto-tiling path on a larger, non-divisible row count (multi-step grid,
    # balanced tail, generation-aware budget).
    x_big = jax.random.normal(jax.random.PRNGKey(2), (4, 37, 128),
                              dtype=jnp.float32)
    out3 = jax.block_until_ready(layer_normalization(x_big, alpha1, bias1))
    ref3 = _layernorm_ref(x_big, alpha1, bias1)
    assert jnp.allclose(out3, ref3, atol=1e-5, rtol=1e-5), "mismatch (auto tile)"

    print("KERNEL_OK")
</pallas_src>

<mosaic_0001>
module attributes {stable_mosaic.version = 11 : i64} {
  func.func @_layernorm_kernel(%arg0: i32, %arg1: memref<1xf32, #tpu.memory_space<smem>>, %arg2: memref<1xf32, #tpu.memory_space<smem>>, %arg3: memref<8x32xf32, #tpu.memory_space<vmem>>, %arg4: memref<8x32xf32, #tpu.memory_space<vmem>>) attributes {dimension_semantics = [#tpu.dimension_semantics<parallel>], iteration_bounds = array<i64: 2>, scalar_prefetch = 0 : i64, scratch_operands = 0 : i64, tpu.core_type = #tpu.core_type<tc>, window_params = [{transform_indices = @transform_0, window_bounds = array<i64: 1>}, {transform_indices = @transform_1, window_bounds = array<i64: 1>}, {transform_indices = @transform_2, window_bounds = array<i64: 8, 32>}, {transform_indices = @transform_3, window_bounds = array<i64: 8, 32>}]} {
    %c0 = arith.constant 0 : index
    %c0_0 = arith.constant 0 : index
    %0 = vector.load %arg3[%c0, %c0_0] : memref<8x32xf32, #tpu.memory_space<vmem>>, vector<8x32xf32>
    %cst = arith.constant dense<0.000000e+00> : vector<8xf32>
    %1 = vector.multi_reduction <add>, %0, %cst [1] : vector<8x32xf32> to vector<8xf32>
    %2 = vector.shape_cast %1 : vector<8xf32> to vector<8x1xf32>
    %cst_1 = arith.constant 3.125000e-02 : f32
    %3 = vector.broadcast %cst_1 : f32 to vector<8x1xf32>
    %4 = arith.mulf %2, %3 : vector<8x1xf32>
    %c0_2 = arith.constant 0 : index
    %c0_3 = arith.constant 0 : index
    %5 = vector.load %arg3[%c0_2, %c0_3] : memref<8x32xf32, #tpu.memory_space<vmem>>, vector<8x32xf32>
    %6 = vector.broadcast %4 : vector<8x1xf32> to vector<8x32xf32>
    %7 = arith.subf %5, %6 : vector<8x32xf32>
    %8 = arith.mulf %7, %7 : vector<8x32xf32>
    %cst_4 = arith.constant dense<0.000000e+00> : vector<8xf32>
    %9 = vector.multi_reduction <add>, %8, %cst_4 [1] : vector<8x32xf32> to vector<8xf32>
    %10 = vector.shape_cast %9 : vector<8xf32> to vector<8x1xf32>
    %cst_5 = arith.constant 3.100000e+01 : f32
    %11 = vector.broadcast %cst_5 : f32 to vector<8x1xf32>
    %12 = arith.divf %10, %11 : vector<8x1xf32>
    %13 = math.sqrt %12 : vector<8x1xf32>
    %c0_6 = arith.constant 0 : index
    %14 = memref.load %arg1[%c0_6] : memref<1xf32, #tpu.memory_space<smem>>
    %c0_7 = arith.constant 0 : index
    %15 = memref.load %arg2[%c0_7] : memref<1xf32, #tpu.memory_space<smem>>
    %16 = arith.mulf %14, %15 : f32
    %cst_8 = arith.constant 9.99999974E-6 : f32
    %17 = vector.broadcast %cst_8 : f32 to vector<8x1xf32>
    %18 = arith.addf %13, %17 : vector<8x1xf32>
    %19 = tpu.reciprocal %18 : vector<8x1xf32> -> vector<8x1xf32>
    %20 = vector.broadcast %16 : f32 to vector<8x1xf32>
    %21 = arith.mulf %20, %19 : vector<8x1xf32>
    %c0_9 = arith.constant 0 : index
    %c0_10 = arith.constant 0 : index
    %22 = vector.load %arg3[%c0_9, %c0_10] : memref<8x32xf32, #tpu.memory_space<vmem>>, vector<8x32xf32>
    %23 = vector.broadcast %4 : vector<8x1xf32> to vector<8x32xf32>
    %24 = arith.subf %22, %23 : vector<8x32xf32>
    %25 = vector.broadcast %21 : vector<8x1xf32> to vector<8x32xf32>
    %26 = arith.mulf %24, %25 : vector<8x32xf32>
    %c0_11 = arith.constant 0 : index
    %c0_12 = arith.constant 0 : index
    %27 = vector.load %arg4[%c0_11, %c0_12] : memref<8x32xf32, #tpu.memory_space<vmem>>, vector<8x32xf32>
    tpu.vector_store %arg4[%c0_11, %c0_12], %26 {strides = array<i32>} : memref<8x32xf32, #tpu.memory_space<vmem>>, vector<8x32xf32>,
    return
  }
  func.func @transform_0(%arg0: i32) -> i32 {
    %c0_i32 = arith.constant 0 : i32
    %c0_i32_0 = arith.constant 0 : i32
    return %c0_i32 : i32
  }
  func.func @transform_1(%arg0: i32) -> i32 {
    %c0_i32 = arith.constant 0 : i32
    %c0_i32_0 = arith.constant 0 : i32
    return %c0_i32 : i32
  }
  func.func @transform_2(%arg0: i32) -> (i32, i32) {
    %c0_i32 = arith.constant 0 : i32
    %c0_i32_0 = arith.constant 0 : i32
    return %arg0, %c0_i32 : i32, i32
  }
  func.func @transform_3(%arg0: i32) -> (i32, i32) {
    %c0_i32 = arith.constant 0 : i32
    %c0_i32_0 = arith.constant 0 : i32
    return %arg0, %c0_i32 : i32, i32
  }
}

</mosaic_0001>

<bundles_post_ra>
// kernel: tpu_custom_call.1
= control target key start
LH: loop header
LB: loop body
LE: loop exit
PB: predicated region body
PF: predicated region fallthrough
CT: control target
= control target key end

     0   :  { %s633_s0 = inlined_call_operand.<no memory space> [shape: f32[1], index: 0, kind: input, shape index: {}]   ;;  %s634_s1 = inlined_call_operand.<no memory space> [shape: f32[1], index: 1, kind: input, shape index: {}]   ;;  %s635_s2 = inlined_call_operand.hbm [shape: f32[16,32], index: 2, kind: input, shape index: {}]   ;;  %s636_s3 = inlined_call_operand.hbm [shape: f32[16,32], index: 3, kind: output, shape index: {}]  }
   0x1   :  { %8 = sst [smem:[#allocation2]] %s633_s0 }
   0x2   :  { %9 = sst [smem:[#allocation3]] %s634_s1 }
   0x3   :  { %10 = vsyncpa [#allocation5], 0 }
   0x4   :  { %12 = vsyncpa [#allocation5 + $0x1], 0 }
   0x5   :  { %13 = vsyncpa [#allocation6], 0 }
   0x6   :  { %15 = vsyncpa [#allocation6 + $0x1], 0  ;;  %s485_s16 = smov 0   ;;  %s487_s17 = smov 0  }
   0x7   :  { %s489_s18 = smov 0   ;;  %s491_s19 = smov 0  }
   0x8 LB: > { %s506_s0 = sadd.s32 4294967295, %s455_s19   ;;  %s301_s1 = sadd.s32 4294967294, %s455_s19   ;;  %s455_s19 = sphi %s491_s19, %s653_s19   ;;  %s451_s18 = sphi %s489_s18, %s652_s18   ;;  %s447_s17 = sphi %s487_s17, %s651_s17   ;;  %s443_s16 = sphi %s485_s16, %s650_s16  }
   0x9   : > { %s510_s20 = sadd.s32 1, %s455_s19   ;;  %s70_s21 = sadd.s32 1, %s451_s18 }
   0xa   : > { %s67_s22 = ssub.s32 %s455_s19, %s510_s20  ;;  %p77_p0 = scmp.ne.s32.totalorder %s451_s18, %s447_s17 }
   0xb   : > { %p68_p1 = scmp.eq.s32.totalorder %s67_s22, 0  ;;  %p78_p2 = scmp.eq.s32.totalorder %s455_s19, 0 }
   0xc   : > { %p83_p3 = scmp.ne.s32.totalorder %s447_s17, %s443_s16  ;;  %p84_p4 = scmp.eq.s32.totalorder %s506_s0, 0 }
   0xd   : > { %s522_s23 = scalar_select %p68_p1, %s451_s18, %s70_s21  }
   0xe   : > { %p524_p5 = por %p78_p2, %p77_p0  ;;  %p528_p6 = por %p84_p4, %p83_p3 }
   0xf   : > { %p107_p7 = scmp.eq.s32.totalorder %s506_s0, 1  ;;  %p113_p8 = scmp.eq.s32.totalorder %s301_s1, 1 }
  0x10   : > { %s640_s25 = scalar_select %p528_p6, 1, 0 }
  0x11   : > { %p325_p10 = scmp.lt.s32.totalorder %s455_s19, 2  ;;  %p535_p11 = por %p107_p7, %p77_p0 }
  0x12   : > { %p539_p12 = por %p113_p8, %p83_p3  ;;  %s139_s28 = sand.u32 1, %s451_s18  }
  0x13   : > { %s641_s26 = scalar_select %p535_p11, 1, 0 }
  0x14   : > { %s642_s27 = scalar_select %p539_p12, 1, 0 }
  0x15   : > { %s305_s29 = sshll.u32 %s455_s19, 7  ;;  %s304_s30 = sshll.u32 %s139_s28, 3 }
  0x16   : > { %s548_s6 = scalar_lea.hbm %s635_s2, %s305_s29  ;;  %s143_s7 = scalar_lea.vmem [#allocation4], %s304_s30 }
  0x17   : > { %s150_s8 = sshll.u32 %s143_s7, 4  ;;  %p552_p13 = pnand %p325_p10, %p524_p5  ;;  %s556_s8 = int_to_ptr.vmem [resolvable:$true] %s150_s8 }
  0x18   : > { %s140_s10 = scalar_lea.sflag [#allocation5], %s139_s28  ;;  %s363_s11 = scalar_lea.hbm %s548_s6, 128 }
  0x19   : > { %p364_p2 = scmp.ne.s32.totalorder %s548_s6, %s363_s11  ;;  %p365_p3 = pneg %p552_p13 }
  0x1a   : > { %s368_s14 = scalar_lea.hbm %s635_s2, 256  ;;  %p369_p5 = scmp.lt.s32.totalorder %s548_s6, %s635_s2 }
  0x1b   : > { %p366_p4 = pnand %p365_p3, %p364_p2  ;;  %p370_p8 = scmp.lt.s32.totalorder %s368_s14, %s363_s11 }
  0x1d   : > { %p367_p7 = pneg %p366_p4  ;;  %p371_p10 = por %p370_p8, %p369_p5 }
  0x1f   : > { %p372_p9 = pnand %p371_p10, %p367_p7 }
  0x21   : > { %375 = shalt.err (!%p372_p9)
}
  0x22   : > { %s376_s21 = scalar_lea.vmem %s556_s8, 128  ;;  %s457_s22 = smov [#allocation4]  }
  0x23   : > { %p377_p0 = scmp.ne.s32.totalorder %s556_s8, %s376_s21  ;;  %s381_s24 = sshll.u32 %s457_s22, 4  ;;  %s382_s24 = int_to_ptr.vmem [resolvable:$false] %s381_s24 }
  0x24   : > { %s383_s28 = scalar_lea.vmem %s382_s24, 256  ;;  %p384_p4 = scmp.lt.s32.totalorder %s556_s8, %s382_s24 }
  0x25   : > { %p379_p1 = pnand %p377_p0, %p365_p3  ;;  %p385_p12 = scmp.lt.s32.totalorder %s383_s28, %s376_s21 }
  0x27   : > { %p380_p2 = pneg %p379_p1  ;;  %p386_p11 = por %p385_p12, %p384_p4 }
  0x29   : > { %p387_p6 = pnand %p386_p11, %p380_p2 }
  0x2b   : > { %390 = shalt.err (!%p387_p6)
}
  0x2c   : > { %320 = dma.hbm_to_vmem [thread:$0]  (!%p552_p13), %s548_s6, 128, %s556_s8, %s140_s10  }
  0x2d   : > { %p644_p9 = scmp.lt.s32.totalorder %s455_s19, 3  ;;  %p645_p7 = scmp.ge.s32.totalorder %s455_s19, 1 }
  0x2f   : > { %p156_p0 = pnand %p645_p7, %p644_p9 }
  0x30   : > { %s583_s29 = sand.u32 (!%p156_p0), 1, %s447_s17   ;;  %p646_p6 = scmp.ne.s32.totalorder (!%p156_p0), %s640_s25, 0 }
  0x31   : > { %159 = sbr.rel (%p156_p0) target bundleno = 393 (0x189), region = 32  ;;  %s307_s30 = sshll.u32 (!%p156_p0), %s583_s29, 3 }
  0x32   : > { %s162_s4 = scalar_lea.sflag (!%p156_p0), [#allocation5], %s583_s29  ;;  %s165_s5 = scalar_lea.vmem (!%p156_p0), [#allocation4], %s307_s30 }
  0x36   : > { %434 = dma.done.wait (%p646_p6), %s162_s4, 128  }
  0x37   : > { %436 = vsyncadd (%p646_p6), %s162_s4, 4294967168  ;;  %vm189_vm0 = vcmask 261120   ;;  %v188_v0 = vld [vmem:[%s165_s5] sm:$0xff]  ;;  %s208_s25 = sld [smem:[#allocation2]]  ;;  %s310_s8 = sshll.u32 %s506_s0, 7 }
  0x38   : > { %v190_v1 = vsel %vm189_vm0, %v188_v0, 0.0  ;;  %s209_s6 = sld [smem:[#allocation3]]  ;;  %s187_s9 = scalar_lea.vmem [#allocation7], %s307_s30 }
  0x39   : > { %191 = vadd.xlane.f32.xlu0 %v190_v1  ;;  %s231_s10 = sshll.u32 %s187_s9, 4  ;;  %s229_s13 = scalar_lea.hbm %s636_s3, %s310_s8  ;;  %s232_s10 = int_to_ptr.vmem [resolvable:$true] %s231_s10 }
  0x3a   : > { %s218_s14 = scalar_lea.sflag [#allocation6], %s583_s29  ;;  %s391_s15 = scalar_lea.vmem %s232_s10, 128 }
  0x3b   : > { %p392_p11 = scmp.ne.s32.totalorder %s232_s10, %s391_s15  ;;  %p647_p12 = scmp.ne.s32.totalorder %s641_s26, 0 }
  0x3c   : > { %s458_s1 = smov [#allocation7]  }
  0x3d   : > { %p393_p13 = pnand %p392_p11, %p647_p12  ;;  %s395_s0 = sshll.u32 %s458_s1, 4  ;;  %s396_s0 = int_to_ptr.vmem [resolvable:$false] %s395_s0 }
  0x3e   : > { %s210_s7 = smul.f32 %s209_s6, %s208_s25  ;;  %s397_s21 = scalar_lea.vmem %s396_s0, 256 }
  0x3f   : > { %p394_p1 = pneg %p393_p13  ;;  %p398_p3 = scmp.lt.s32.totalorder %s232_s10, %s396_s0 }
  0x40   : > { %v213_v15 = vstv %s210_s7  ;;  %p399_p5 = scmp.lt.s32.totalorder %s397_s21, %s391_s15 }
  0x42   : > { %p400_p8 = por %p399_p5, %p398_p3 }
  0x44   : > { %p401_p10 = pnand %p400_p8, %p394_p1 }
  0xc2   : > { %v192_v2 = vpop.xlane.xlu0 %191 }
  0xc3   : > { %v193_v3 = vmul.f32 0.03125, %v192_v2 }
  0xc5   : > { %v194_v4 = vsub.f32 %v188_v0, %v193_v3 }
  0xc7   : > { %v195_v5 = vmul.f32 %v194_v4, %v194_v4 }
  0xc9   : > { %v196_v6 = vsel %vm189_vm0, %v195_v5, 0.0 }
  0xca   : > { %197 = vadd.xlane.f32.xlu0 %v196_v6 }
 0x153   : > { %v198_v7 = vpop.xlane.xlu0 %197 }
 0x154   : > { %v200_v8 = vmul.f32 0.032258064, %v198_v7 }
 0x156   : > { %359 = vrsqrt.f32 %v200_v8  ;;  %vm203_vm1 = vcmp.eq.f32.partialorder %v200_v8, inf  ;;  %v206_v11 = vand.u32 2147483648, %v200_v8  ;;  %vm205_vm2 = vcmp.eq.f32.partialorder %v200_v8, 0.0 }
 0x163   : > { %v360_v9 = vpop.eup %359 }
 0x164   : > { %v202_v10 = vmul.f32 %v360_v9, %v200_v8 }
 0x166   : > { %v204_v12 = vsel %vm203_vm1, %v200_v8, %v202_v10 }
 0x167   : > { %v207_v13 = vsel %vm205_vm2, %v206_v11, %v204_v12 }
 0x168   : > { %v211_v14 = vadd.f32 1e-05, %v207_v13 }
 0x16a   : > { %361 = vrcp.f32 %v211_v14 }
 0x177   : > { %v362_v16 = vpop.eup %361 }
 0x178   : > { %v214_v17 = vmul.f32 %v362_v16, %v213_v15 }
 0x17a   : > { %v215_v18 = vmul.f32 %v214_v17, %v194_v4 }
 0x17c   : > { %216 = vst.msk [vmem:[%s187_s9] sm:$0xff] %vm189_vm0, %v215_v18 }
 0x17d   : > { %404 = shalt.err (!%p401_p10)
}
 0x17e   : > { %s405_s22 = scalar_lea.hbm %s229_s13, 128  ;;  %s409_s29 = scalar_lea.hbm %s636_s3, 256 }
 0x17f   : > { %p406_p2 = scmp.ne.s32.totalorder %s229_s13, %s405_s22  ;;  %p410_p7 = scmp.lt.s32.totalorder %s229_s13, %s636_s3 }
 0x180   : > { %p411_p0 = scmp.lt.s32.totalorder %s409_s29, %s405_s22 }
 0x181   : > { %p407_p4 = pnand %p406_p2, %p647_p12 }
 0x182   : > { %p412_p6 = por %p411_p0, %p410_p7 }
 0x183   : > { %p408_p9 = pneg %p407_p4 }
 0x185   : > { %p413_p11 = pnand %p412_p6, %p408_p9 }
 0x187   : > { %416 = shalt.err (!%p413_p11)
}
 0x188   : > { %315 = dma.vmem_to_hbm [thread:$0]  (%p647_p12), %s232_s10, 128, %s229_s13, %s218_s14  }
 0x189 PF: > { %s243_s5 = sand.u32 1, %s443_s16   ;;  %p648_p13 = scmp.ne.s32.totalorder %s642_s27, 0 }
 0x18a   : > { %p649_p1 = scmp.ge.s32.totalorder %s455_s19, 2  ;;  %s244_s25 = scalar_lea.sflag [#allocation6], %s243_s5 }
 0x18c   : > { %p322_p3 = pnand %p649_p1, %p648_p13 }
 0x18e   : > { %p323_p5 = pneg %p322_p3 }
 0x190   : > { %438 = dma.done.wait (%p323_p5), %s244_s25, 128  }
 0x191   : > { %440 = vsyncadd (%p323_p5), %s244_s25, 4294967168  ;;  %p18_p8 = scmp.ge.s32.totalorder %s510_s20, 4   ;;  %s650_s16 = smov %s447_s17 }
 0x192   : > { %s651_s17 = smov %s451_s18  ;;  %s652_s18 = smov %s522_s23 }
 0x193   : > { %s653_s19 = smov %s510_s20  ;;  %20 = sbr.rel (!%p18_p8) target bundleno = 8 (0x8), region = 77 }
 0x198   :  { %249 = vsyncpa [#allocation5], 1 }
 0x199   :  { %251 = vsyncpa [#allocation5 + $0x1], 1 }
 0x19a   :  { %252 = vsyncpa [#allocation6], 1 }
 0x19b   :  { %254 = vsyncpa [#allocation6 + $0x1], 1 }

</bundles_post_ra>
